<compile_context>
chip_gen: v6e
topology: v6e:2x2x1
jax: 0.10.0
libtpu: 0.0.40
codegen_flags: <defaults>
</compile_context>

<pallas_src>
import functools

import jax
import jax.numpy as jnp
from jax.experimental import pallas as pl
from jax.experimental.pallas import tpu as pltpu

_LANE = 128        # lane width: pad hidden/output feature dims to this
_SUBLANE = 8       # f32 sublane count: batch tile must be a multiple of this
_TILE_B_MAX = 256  # batch tile size (sweet spot per measured tile-size curve)


def _round_up(x, m):
    return ((x + m - 1) // m) * m


def _fcn_fused_kernel(*refs, num_layers):
    """refs = (x_ref, w0, b0, w1, b1, ..., w_{n-1}, b_{n-1}, o_ref).

    x: [TILE_B, D0] (f32, feature dim unpadded), w_i: bf16 [D_i(_p), D_{i+1}p],
    b_i: f32 [1, D_{i+1}p], o: [TILE_B, Dnp].  Activations never leave
    VMEM/vregs; matmuls run bf16 on the MXU with f32 accumulation.
    """
    x_ref = refs[0]
    o_ref = refs[-1]
    wb = refs[1:-1]

    h = x_ref[...].astype(jnp.bfloat16)
    acc = None
    for i in range(num_layers):
        w = wb[2 * i][...]       # bf16
        b = wb[2 * i + 1][...]   # f32
        acc = jnp.dot(h, w, preferred_element_type=jnp.float32) + b
        if i < num_layers - 1:
            acc = jnp.tanh(acc)          # f32 on the EUP
            h = acc.astype(jnp.bfloat16)  # bf16 into the next MXU pass
    o_ref[...] = acc.astype(o_ref.dtype)


def init_fcn_params(layers, key):
    """Deterministic init matching nn.Linear shapes.

    Returns list of (W[in, out], b[out]) in f32 — W already transposed relative
    to PyTorch's [out, in] storage so the kernel does a plain x @ W.
    """
    params = []
    for i in range(len(layers) - 1):
        fan_in, fan_out = layers[i], layers[i + 1]
        key, kw, kb = jax.random.split(key, 3)
        bound = 1.0 / jnp.sqrt(fan_in)
        w = jax.random.uniform(kw, (fan_in, fan_out), jnp.float32, -bound, bound)
        b = jax.random.uniform(kb, (fan_out,), jnp.float32, -bound, bound)
        params.append((w, b))
    return params


def pad_params(params):
    """One-time prep: bf16 weights, lane-padded output dims.

    Layer 0 keeps its natural (unpadded) input dim so x never needs feature
    padding; layers > 0 pad the input dim to match the previous layer's padded
    output.  Biases stay f32 (added to the f32 accumulator).
    """
    padded = []
    for i, (w, b) in enumerate(params):
        din, dout = w.shape
        dip = din if i == 0 else _round_up(din, _LANE)
        dop = _round_up(dout, _LANE)
        wp = (jnp.zeros((dip, dop), jnp.bfloat16)
              .at[:din, :dout].set(w.astype(jnp.bfloat16)))
        bp = jnp.zeros((1, dop), jnp.float32).at[0, :dout].set(b)
        padded.append((wp, bp))
    return padded


@functools.partial(jax.jit, static_argnames=("out_dim",))
def fcn_forward(x, padded_params, out_dim):
    """Fused MLP forward: single pallas_call, batch-tiled, weights resident."""
    B, din = x.shape
    num_layers = len(padded_params)

    # --- batch tiling (sublane-aligned; cheap batch-only pad if needed) -----
    bp8 = _round_up(max(B, _SUBLANE), _SUBLANE)
    tile_b = min(_TILE_B_MAX, bp8)
    bp = _round_up(bp8, tile_b)
    if bp != B:
        x = jnp.pad(x, ((0, bp - B), (0, 0)))
    grid = (bp // tile_b,)

    dout_p = padded_params[-1][0].shape[1]

    # --- specs: x/out tiled over batch, weights/biases constant-resident ----
    flat = []
    in_specs = [pl.BlockSpec((tile_b, din), lambda i: (i, 0))]
    for w, b in padded_params:
        flat.append(w)
        flat.append(b)
        in_specs.append(pl.BlockSpec(w.shape, lambda i: (0, 0)))
        in_specs.append(pl.BlockSpec(b.shape, lambda i: (0, 0)))
    out_spec = pl.BlockSpec((tile_b, dout_p), lambda i: (i, 0))

    # --- VMEM budget & cost estimate ----------------------------------------
    weight_bytes = sum(int(w.size) * w.dtype.itemsize + int(b.size) * b.dtype.itemsize
                       for w, b in padded_params)
    max_dp = max(int(w.shape[1]) for w, _ in padded_params)
    act_bytes = 4 * tile_b * max_dp * 4                      # f32 activation headroom
    io_bytes = 2 * 2 * (tile_b * din * 4 + tile_b * dout_p * 4)  # double-buffered x/out
    vmem_limit = int(min(max(32 << 20, 2 * (weight_bytes + act_bytes + io_bytes)),
                         100 << 20))

    flops = 2 * bp * sum(int(w.shape[0]) * int(w.shape[1]) for w, _ in padded_params)
    transcendentals = bp * sum(int(w.shape[1]) for w, _ in padded_params[:-1])
    bytes_accessed = (bp * din * 4 + bp * dout_p * 4 + weight_bytes)

    kernel = functools.partial(_fcn_fused_kernel, num_layers=num_layers)

    out_padded = pl.pallas_call(
        kernel,
        out_shape=jax.ShapeDtypeStruct((bp, dout_p), x.dtype),
        grid=grid,
        in_specs=in_specs,
        out_specs=out_spec,
        compiler_params=pltpu.CompilerParams(
            dimension_semantics=("parallel",),
            vmem_limit_bytes=vmem_limit,
        ),
        cost_estimate=pl.CostEstimate(
            flops=flops,
            transcendentals=transcendentals,
            bytes_accessed=bytes_accessed,
        ),
    )(x, *flat)

    return out_padded[:B, :out_dim]


if __name__ == "__main__":
    key = jax.random.PRNGKey(0)

    # FCN(layers=[16, 32, 32, 8]) applied to a batch of 8 inputs.
    layers = [16, 32, 32, 8]
    batch = 8

    key, kx = jax.random.split(key)
    x = jax.random.normal(kx, (batch, layers[0]), jnp.float32)

    params = init_fcn_params(layers, key)
    padded_params = pad_params(params)

    out = fcn_forward(x, padded_params, layers[-1])
    jax.block_until_ready(out)

    # Reference in plain JAX mirroring the kernel's bf16-weight / f32-accumulate
    # numerics (padding itself is exact and does not affect the math).
    ref = x
    for i, (w, b) in enumerate(params):
        ref = jnp.dot(ref.astype(jnp.bfloat16), w.astype(jnp.bfloat16),
                      preferred_element_type=jnp.float32) + b
        if i < len(params) - 1:
            ref = jnp.tanh(ref)

    assert out.shape == (batch, layers[-1])
    assert jnp.allclose(out, ref, atol=2e-3, rtol=2e-3)

    print("KERNEL_OK")
</pallas_src>

<mosaic_0001>
module attributes {stable_mosaic.version = 11 : i64} {
  func.func @_fcn_fused_kernel(%arg0: i32, %arg1: memref<8x16xf32, #tpu.memory_space<vmem>>, %arg2: memref<16x128xbf16, #tpu.memory_space<vmem>>, %arg3: memref<1x128xf32, #tpu.memory_space<vmem>>, %arg4: memref<128x128xbf16, #tpu.memory_space<vmem>>, %arg5: memref<1x128xf32, #tpu.memory_space<vmem>>, %arg6: memref<128x128xbf16, #tpu.memory_space<vmem>>, %arg7: memref<1x128xf32, #tpu.memory_space<vmem>>, %arg8: memref<8x128xf32, #tpu.memory_space<vmem>>) attributes {dimension_semantics = [#tpu.dimension_semantics<parallel>], iteration_bounds = array<i64: 1>, scalar_prefetch = 0 : i64, scratch_operands = 0 : i64, tpu.core_type = #tpu.core_type<tc>, window_params = [{transform_indices = @transform_0, window_bounds = array<i64: 8, 16>}, {pipeline_mode = #tpu.pipeline_mode<synchronous>, transform_indices = @transform_1, window_bounds = array<i64: 16, 128>}, {pipeline_mode = #tpu.pipeline_mode<synchronous>, transform_indices = @transform_2, window_bounds = array<i64: 1, 128>}, {pipeline_mode = #tpu.pipeline_mode<synchronous>, transform_indices = @transform_3, window_bounds = array<i64: 128, 128>}, {pipeline_mode = #tpu.pipeline_mode<synchronous>, transform_indices = @transform_4, window_bounds = array<i64: 1, 128>}, {pipeline_mode = #tpu.pipeline_mode<synchronous>, transform_indices = @transform_5, window_bounds = array<i64: 128, 128>}, {pipeline_mode = #tpu.pipeline_mode<synchronous>, transform_indices = @transform_6, window_bounds = array<i64: 1, 128>}, {transform_indices = @transform_7, window_bounds = array<i64: 8, 128>}]} {
    %c0 = arith.constant 0 : index
    %c0_0 = arith.constant 0 : index
    %0 = vector.load %arg1[%c0, %c0_0] : memref<8x16xf32, #tpu.memory_space<vmem>>, vector<8x16xf32>
    %1 = arith.truncf %0 : vector<8x16xf32> to vector<8x16xbf16>
    %c0_1 = arith.constant 0 : index
    %c0_2 = arith.constant 0 : index
    %2 = vector.load %arg2[%c0_1, %c0_2] : memref<16x128xbf16, #tpu.memory_space<vmem>>, vector<16x128xbf16>
    %c0_3 = arith.constant 0 : index
    %c0_4 = arith.constant 0 : index
    %3 = vector.load %arg3[%c0_3, %c0_4] : memref<1x128xf32, #tpu.memory_space<vmem>>, vector<1x128xf32>
    %cst = arith.constant dense<0.000000e+00> : vector<8x128xf32>
    %4 = tpu.matmul %1, %2, %cst {dimension_numbers = #tpu.dot_dimension_numbers<[1], [0], [0], [1], [0, 0, 1, 1], [], []>} : vector<8x16xbf16>, vector<16x128xbf16>, vector<8x128xf32> -> vector<8x128xf32>
    %5 = vector.broadcast %3 : vector<1x128xf32> to vector<8x128xf32>
    %6 = arith.addf %4, %5 : vector<8x128xf32>
    %7 = math.tanh %6 : vector<8x128xf32>
    %8 = arith.truncf %7 : vector<8x128xf32> to vector<8x128xbf16>
    %c0_5 = arith.constant 0 : index
    %c0_6 = arith.constant 0 : index
    %9 = vector.load %arg4[%c0_5, %c0_6] : memref<128x128xbf16, #tpu.memory_space<vmem>>, vector<128x128xbf16>
    %c0_7 = arith.constant 0 : index
    %c0_8 = arith.constant 0 : index
    %10 = vector.load %arg5[%c0_7, %c0_8] : memref<1x128xf32, #tpu.memory_space<vmem>>, vector<1x128xf32>
    %cst_9 = arith.constant dense<0.000000e+00> : vector<8x128xf32>
    %11 = tpu.matmul %8, %9, %cst_9 {dimension_numbers = #tpu.dot_dimension_numbers<[1], [0], [0], [1], [0, 0, 1, 1], [], []>} : vector<8x128xbf16>, vector<128x128xbf16>, vector<8x128xf32> -> vector<8x128xf32>
    %12 = vector.broadcast %10 : vector<1x128xf32> to vector<8x128xf32>
    %13 = arith.addf %11, %12 : vector<8x128xf32>
    %14 = math.tanh %13 : vector<8x128xf32>
    %15 = arith.truncf %14 : vector<8x128xf32> to vector<8x128xbf16>
    %c0_10 = arith.constant 0 : index
    %c0_11 = arith.constant 0 : index
    %16 = vector.load %arg6[%c0_10, %c0_11] : memref<128x128xbf16, #tpu.memory_space<vmem>>, vector<128x128xbf16>
    %c0_12 = arith.constant 0 : index
    %c0_13 = arith.constant 0 : index
    %17 = vector.load %arg7[%c0_12, %c0_13] : memref<1x128xf32, #tpu.memory_space<vmem>>, vector<1x128xf32>
    %cst_14 = arith.constant dense<0.000000e+00> : vector<8x128xf32>
    %18 = tpu.matmul %15, %16, %cst_14 {dimension_numbers = #tpu.dot_dimension_numbers<[1], [0], [0], [1], [0, 0, 1, 1], [], []>} : vector<8x128xbf16>, vector<128x128xbf16>, vector<8x128xf32> -> vector<8x128xf32>
    %19 = vector.broadcast %17 : vector<1x128xf32> to vector<8x128xf32>
    %20 = arith.addf %18, %19 : vector<8x128xf32>
    %c0_15 = arith.constant 0 : index
    %c0_16 = arith.constant 0 : index
    %21 = vector.load %arg8[%c0_15, %c0_16] : memref<8x128xf32, #tpu.memory_space<vmem>>, vector<8x128xf32>
    tpu.vector_store %arg8[%c0_15, %c0_16], %20 {strides = array<i32>} : memref<8x128xf32, #tpu.memory_space<vmem>>, vector<8x128xf32>,
    return
  }
  func.func @transform_0(%arg0: i32) -> (i32, i32) {
    %c0_i32 = arith.constant 0 : i32
    %c0_i32_0 = arith.constant 0 : i32
    return %arg0, %c0_i32 : i32, i32
  }
  func.func @transform_1(%arg0: i32) -> (i32, i32) {
    %c0_i32 = arith.constant 0 : i32
    %c0_i32_0 = arith.constant 0 : i32
    %c0_i32_1 = arith.constant 0 : i32
    return %c0_i32, %c0_i32_0 : i32, i32
  }
  func.func @transform_2(%arg0: i32) -> (i32, i32) {
    %c0_i32 = arith.constant 0 : i32
    %c0_i32_0 = arith.constant 0 : i32
    %c0_i32_1 = arith.constant 0 : i32
    return %c0_i32, %c0_i32_0 : i32, i32
  }
  func.func @transform_3(%arg0: i32) -> (i32, i32) {
    %c0_i32 = arith.constant 0 : i32
    %c0_i32_0 = arith.constant 0 : i32
    %c0_i32_1 = arith.constant 0 : i32
    return %c0_i32, %c0_i32_0 : i32, i32
  }
  func.func @transform_4(%arg0: i32) -> (i32, i32) {
    %c0_i32 = arith.constant 0 : i32
    %c0_i32_0 = arith.constant 0 : i32
    %c0_i32_1 = arith.constant 0 : i32
    return %c0_i32, %c0_i32_0 : i32, i32
  }
  func.func @transform_5(%arg0: i32) -> (i32, i32) {
    %c0_i32 = arith.constant 0 : i32
    %c0_i32_0 = arith.constant 0 : i32
    %c0_i32_1 = arith.constant 0 : i32
    return %c0_i32, %c0_i32_0 : i32, i32
  }
  func.func @transform_6(%arg0: i32) -> (i32, i32) {
    %c0_i32 = arith.constant 0 : i32
    %c0_i32_0 = arith.constant 0 : i32
    %c0_i32_1 = arith.constant 0 : i32
    return %c0_i32, %c0_i32_0 : i32, i32
  }
  func.func @transform_7(%arg0: i32) -> (i32, i32) {
    %c0_i32 = arith.constant 0 : i32
    %c0_i32_0 = arith.constant 0 : i32
    return %arg0, %c0_i32 : i32, i32
  }
}

</mosaic_0001>

<bundles_post_ra>
// kernel: fcn_forward.1
= control target key start
LH: loop header
LB: loop body
LE: loop exit
PB: predicated region body
PF: predicated region fallthrough
CT: control target
= control target key end

     0   :  { %12 = vsyncpa [#allocation3], 0  ;;  %s716_s0 = inlined_call_operand.hbm [shape: f32[8,16], index: 0, kind: input, shape index: {}]   ;;  %s717_s1 = inlined_call_operand.hbm [shape: bf16[16,128], index: 1, kind: input, shape index: {}]   ;;  %s718_s2 = inlined_call_operand.vmem [shape: f32[1,128], index: 2, kind: input, shape index: {}]   ;;  %s719_s3 = inlined_call_operand.hbm [shape: bf16[128,128], index: 3, kind: input, shape index: {}]   ;;  %s720_s4 = inlined_call_operand.vmem [shape: f32[1,128], index: 4, kind: input, shape index: {}]   ;;  %s721_s5 = inlined_call_operand.hbm [shape: bf16[128,128], index: 5, kind: input, shape index: {}]   ;;  %s722_s6 = inlined_call_operand.vmem [shape: f32[1,128], index: 6, kind: input, shape index: {}]   ;;  %s723_s7 = inlined_call_operand.hbm [shape: f32[8,128], index: 7, kind: output, shape index: {}]  }
   0x1   :  { %13 = vsyncpa [#allocation6], 0 }
   0x2   :  { %14 = vsyncpa [#allocation9], 0 }
   0x3   :  { %15 = vsyncpa [#allocation4], 0  ;;  %s611_s24 = smov [#allocation5]  }
   0x4   :  { %s31_s25 = sshll.u32 %s611_s24, 4  ;;  %s32_s25 = int_to_ptr.vmem [resolvable:$true] %s31_s25 }
   0x5   :  { %s511_s26 = scalar_lea.vmem %s32_s25, 128  ;;  %p516_p1 = scmp.lt.s32.totalorder %s32_s25, %s32_s25 }
   0x6   :  { %p512_p0 = scmp.ne.s32.totalorder %s32_s25, %s511_s26  ;;  %p517_p2 = scmp.lt.s32.totalorder %s511_s26, %s511_s26 }
   0x8   :  { %p518_p3 = por %p517_p2, %p516_p1 }
   0xa   :  { %p519_p4 = pnand %p518_p3, %p512_p0 }
   0xc   :  { %522 = shalt.err (!%p519_p4)
}
   0xd   :  { %s612_s27 = smov 64   ;;  %s613_s28 = smov 4  }
   0xe   :  { %37 = dma.hbm_to_vmem [thread:$0]  %s717_s1, 128, %s32_s25, [#allocation6], %s612_s27, %s612_s27, %s613_s28  }
   0xf   :  { %s614_s8 = smov [#allocation2]   ;;  %s615_s10 = smov [#allocation7]  }
  0x10   :  { %s22_s9 = sshll.u32 %s614_s8, 4  ;;  %s45_s11 = sshll.u32 %s615_s10, 4  ;;  %s23_s9 = int_to_ptr.vmem [resolvable:$true] %s22_s9  ;;  %s46_s11 = int_to_ptr.vmem [resolvable:$true] %s45_s11 }
  0x11   :  { %s531_s12 = scalar_lea.vmem %s23_s9, 128  ;;  %p536_p6 = scmp.lt.s32.totalorder %s23_s9, %s23_s9 }
  0x12   :  { %p532_p5 = scmp.ne.s32.totalorder %s23_s9, %s531_s12  ;;  %p537_p7 = scmp.lt.s32.totalorder %s531_s12, %s531_s12 }
  0x14   :  { %p538_p8 = por %p537_p7, %p536_p6 }
  0x16   :  { %p539_p9 = pnand %p538_p8, %p532_p5 }
  0x18   :  { %542 = shalt.err (!%p539_p9)
}
  0x19   :  { %25 = dma.hbm_to_vmem [thread:$0]  %s716_s0, 128, %s23_s9, [#allocation3]  }
  0x1a   :  { %s551_s15 = scalar_lea.vmem %s46_s11, 1024  ;;  %p556_p11 = scmp.lt.s32.totalorder %s46_s11, %s46_s11 }
  0x1b   :  { %p552_p10 = scmp.ne.s32.totalorder %s46_s11, %s551_s15  ;;  %p557_p12 = scmp.lt.s32.totalorder %s551_s15, %s551_s15 }
  0x1d   :  { %p558_p13 = por %p557_p12, %p556_p11 }
  0x1f   :  { %p559_p0 = pnand %p558_p13, %p552_p10 }
  0x21   :  { %562 = shalt.err (!%p559_p0)
}
  0x22   :  { %51 = dma.hbm_to_vmem [thread:$0]  %s719_s3, 1024, %s46_s11, [#allocation6], %s612_s27, %s612_s27, %s613_s28  }
  0x23   :  { %s616_s17 = smov [#allocation8]  }
  0x24   :  { %s59_s18 = sshll.u32 %s616_s17, 4  ;;  %s60_s18 = int_to_ptr.vmem [resolvable:$true] %s59_s18 }
  0x25   :  { %s571_s19 = scalar_lea.vmem %s60_s18, 1024  ;;  %p576_p2 = scmp.lt.s32.totalorder %s60_s18, %s60_s18 }
  0x26   :  { %p572_p1 = scmp.ne.s32.totalorder %s60_s18, %s571_s19  ;;  %p577_p3 = scmp.lt.s32.totalorder %s571_s19, %s571_s19 }
  0x28   :  { %p578_p4 = por %p577_p3, %p576_p2 }
  0x2a   :  { %p579_p5 = pnand %p578_p4, %p572_p1 }
  0x2c   :  { %582 = shalt.err (!%p579_p5)
}
  0x2d   :  { %65 = dma.hbm_to_vmem [thread:$0]  %s721_s5, 1024, %s60_s18, [#allocation9], %s612_s27, %s612_s27, %s613_s28  }
  0x2e   :  { %603 = dma.done.wait [#allocation3], 128  }
  0x2f   :  { %604 = vsyncadd [#allocation3], 4294967168 }
  0x30   :  { %605 = dma.done.wait [#allocation6], 1152  }
  0x31   :  { %606 = vsyncadd [#allocation6], 4294966144 }
  0x32   :  { %607 = dma.done.wait [#allocation9], 1024  }
  0x33   :  { %608 = vsyncadd [#allocation9], 4294966272  ;;  %v617_v0 = vmov 0.0   ;;  %vm618_vm0 = vmmov 0   ;;  %v482_v1 = vld [vmem:[#allocation5] sm:$0xff]   ;;  %v81_v2 = vld [vmem:[#allocation2] sm:$0xff] }
  0x34   :  { %427 = vmatprep.subr.bf16.mxu0 %v617_v0  ;;  %429 = vmatprep.mubr.msk.bf16.mxu0 %vm618_vm0, %v617_v0  ;;  %v82_v3 = vpack.c.bf16 %v81_v2, %v81_v2  ;;  %vm98_vm1 = vcmask 130048   ;;  %v483_v4 = vld [vmem:[#allocation7 + $0x38] sm:$0xff]   ;;  %v484_v5 = vld [vmem:[#allocation7 + $0x30] sm:$0xff]   ;;  %v485_v6 = vld [vmem:[#allocation7 + $0x28] sm:$0xff]   ;;  %s619_s24 = smov [#allocation10]  }
  0x35   :  { %433 = vmatprep.subr.bf16.mxu1 %v617_v0  ;;  %449 = vmatprep.mubr.msk.bf16.mxu1 %vm618_vm0, %v617_v0  ;;  %v486_v7 = vld [vmem:[#allocation7 + $0x20] sm:$0xff]   ;;  %v487_v8 = vld [vmem:[#allocation7 + $0x18] sm:$0xff]   ;;  %v488_v9 = vld [vmem:[#allocation7 + $0x10] sm:$0xff]   ;;  %s375_s25 = sshll.u32 %s619_s24, 4  ;;  %s376_s25 = int_to_ptr.vmem [resolvable:$true] %s375_s25 }
  0x36   :  { %428 = vmatpush3.bf16.msra.mxu0 %v482_v1  ;;  %434 = vmatpush3.bf16.msra.mxu1 %v483_v4  ;;  %v489_v10 = vld [vmem:[#allocation7 + $0x8] sm:$0xff]   ;;  %v490_v11 = vld [vmem:[#allocation7] sm:$0xff]   ;;  %v491_v12 = vld [vmem:[#allocation8 + $0x38] sm:$0xff]   ;;  %p588_p7 = scmp.lt.s32.totalorder %s376_s25, %s376_s25 }
  0x37   :  { %453 = vmatprep.subr.bf16.mxu0 %v617_v0  ;;  %435 = vmatprep.subr.bf16.mxu1 %v617_v0  ;;  %v492_v13 = vld [vmem:[#allocation8 + $0x30] sm:$0xff]   ;;  %v493_v14 = vld [vmem:[#allocation8 + $0x28] sm:$0xff]   ;;  %v494_v23 = vld [vmem:[#allocation8 + $0x20] sm:$0xff]  }
  0x38   :  { %v386_v15 = vld [vmem:[%s718_s2] ss:$0 sm:$0xff]  ;;  %v495_v24 = vld [vmem:[#allocation8 + $0x18] sm:$0xff]   ;;  %v497_v26 = vld [vmem:[#allocation8 + $0x8] sm:$0xff]  }
  0x39   :  { %430 = vmatmul.mubr.msk.bf16.vlgmr.msra.gmra.mxu0 %vm98_vm1, %v82_v3  ;;  %v496_v25 = vld [vmem:[#allocation8 + $0x10] sm:$0xff]   ;;  %v498_v27 = vld [vmem:[#allocation8] sm:$0xff]  }
  0x3a   :  { %469 = vmatprep.mubr.msk.bf16.mxu0 %vm618_vm0, %v617_v0  ;;  %436 = vmatpush3.bf16.msra.mxu1 %v484_v5  ;;  %v389_v28 = vld [vmem:[%s720_s4] ss:$0 sm:$0xff]  ;;  %s583_s4 = scalar_lea.vmem %s376_s25, 128 }
  0x3b   :  { %437 = vmatprep.subr.bf16.mxu1 %v617_v0  ;;  %454 = vmatpush3.bf16.msra.mxu0 %v491_v12  ;;  %v398_v36 = vld [vmem:[%s722_s6] ss:$0 sm:$0xff]  ;;  %p584_p6 = scmp.ne.s32.totalorder %s376_s25, %s583_s4  ;;  %p589_p8 = scmp.lt.s32.totalorder %s583_s4, %s583_s4 }
  0x3c   :  { %455 = vmatprep.subr.bf16.mxu0 %v617_v0 }
  0x3d   :  { %p590_p9 = por %p589_p8, %p588_p7 }
  0x3e   :  { %438 = vmatpush3.bf16.msra.mxu1 %v485_v6 }
  0x3f   :  { %439 = vmatprep.subr.bf16.mxu1 %v617_v0  ;;  %456 = vmatpush3.bf16.msra.mxu0 %v492_v13  ;;  %p591_p10 = pnand %p590_p9, %p584_p6 }
  0x40   :  { %457 = vmatprep.subr.bf16.mxu0 %v617_v0 }
  0x42   :  { %440 = vmatpush3.bf16.msra.mxu1 %v486_v7 }
  0x43   :  { %441 = vmatprep.subr.bf16.mxu1 %v617_v0  ;;  %458 = vmatpush3.bf16.msra.mxu0 %v493_v14 }
  0x44   :  { %459 = vmatprep.subr.bf16.mxu0 %v617_v0 }
  0x46   :  { %442 = vmatpush3.bf16.msra.mxu1 %v487_v8 }
  0x47   :  { %443 = vmatprep.subr.bf16.mxu1 %v617_v0  ;;  %460 = vmatpush3.bf16.msra.mxu0 %v494_v23 }
  0x48   :  { %461 = vmatprep.subr.bf16.mxu0 %v617_v0 }
  0x4a   :  { %444 = vmatpush3.bf16.msra.mxu1 %v488_v9 }
  0x4b   :  { %445 = vmatprep.subr.bf16.mxu1 %v617_v0  ;;  %462 = vmatpush3.bf16.msra.mxu0 %v495_v24 }
  0x4c   :  { %463 = vmatprep.subr.bf16.mxu0 %v617_v0 }
  0x4e   :  { %446 = vmatpush3.bf16.msra.mxu1 %v489_v10 }
  0x4f   :  { %447 = vmatprep.subr.bf16.mxu1 %v617_v0  ;;  %464 = vmatpush3.bf16.msra.mxu0 %v496_v25 }
  0x50   :  { %465 = vmatprep.subr.bf16.mxu0 %v617_v0 }
  0x52   :  { %448 = vmatpush3.bf16.msra.mxu1 %v490_v11 }
  0x53   :  { %466 = vmatpush3.bf16.msra.mxu0 %v497_v26 }
  0x54   :  { %467 = vmatprep.subr.bf16.mxu0 %v617_v0 }
  0x57   :  { %468 = vmatpush3.bf16.msra.mxu0 %v498_v27 }
  0xf9   :  { %v136_v16 = vpop.f32.mrf.mxu0 }
  0xfa   :  { %v137_v17 = vadd.f32 %v386_v15, %v136_v16 }
  0xfb   :  { %v431_v18 = vpop.f32.mrf.mxu0 }
  0xfc   :  { %499 = vtanh.f32 %v137_v17 }
  0xfd   :  { %v139_v19 = vpop.f32.mrf.mxu0 }
  0xff   :  { %v432_v20 = vpop.f32.mrf.mxu0 }
 0x109   :  { %v500_v21 = vpop.eup %499 }
 0x10a   :  { %v143_v22 = vpack.c.bf16 %v500_v21, %v500_v21 }
 0x10c   :  { %450 = vmatmul.mubr.bf16.vlgmr.msra.gmra.mxu1 %v143_v22 }
 0x1cc   :  { %v249_v29 = vpop.f32.mrf.mxu1 }
 0x1cd   :  { %v250_v30 = vadd.f32 %v389_v28, %v249_v29 }
 0x1ce   :  { %v451_v31 = vpop.f32.mrf.mxu1 }
 0x1cf   :  { %501 = vtanh.f32 %v250_v30 }
 0x1d0   :  { %v252_v32 = vpop.f32.mrf.mxu1 }
 0x1d2   :  { %v452_v33 = vpop.f32.mrf.mxu1 }
 0x1dc   :  { %v502_v34 = vpop.eup %501 }
 0x1dd   :  { %v256_v35 = vpack.c.bf16 %v502_v34, %v502_v34 }
 0x1df   :  { %470 = vmatmul.mubr.bf16.vlgmr.msra.gmra.mxu0 %v256_v35 }
 0x29f   :  { %v362_v37 = vpop.f32.mrf.mxu0 }
 0x2a0   :  { %v363_v38 = vadd.f32 %v398_v36, %v362_v37 }
 0x2a1   :  { %v471_v39 = vpop.f32.mrf.mxu0 }
 0x2a2   :  { %368 = vst [vmem:[#allocation10] sm:$0xff] %v363_v38 }
 0x2a3   :  { %v365_v40 = vpop.f32.mrf.mxu0 }
 0x2a4   :  { %594 = shalt.err (!%p591_p10)
}
 0x2a5   :  { %378 = dma.vmem_to_hbm [thread:$0]  %s376_s25, 128, %s723_s7, [#allocation4]   ;;  %v472_v41 = vpop.f32.mrf.mxu0 }
 0x2a6   :  { %609 = dma.done.wait [#allocation4], 128  }
 0x2a7   :  { %610 = vsyncadd [#allocation4], 4294967168 }
 0x2a8   :  { %382 = vsyncpa [#allocation3], 1 }
 0x2a9   :  { %383 = vsyncpa [#allocation6], 1 }
 0x2aa   :  { %384 = vsyncpa [#allocation9], 1 }
 0x2ab   :  { %385 = vsyncpa [#allocation4], 1 }

</bundles_post_ra>
